<compile_context>
chip_gen: v7x
topology: tpu7x:2x2x1
jax: 0.10.0
libtpu: 0.0.40
codegen_flags: <defaults>
</compile_context>

<pallas_src>
import jax
import jax.numpy as jnp
from jax.experimental import pallas as pl
from jax.experimental.pallas import tpu as pltpu


def _mlp_kernel(x_ref, w1_ref, b1_ref, w2_ref, b2_ref, o_ref):
    # Layer 1: MXU matmul (f32 accumulate) + lane-dense VPU bias-add / ReLU.
    h = jnp.dot(x_ref[...], w1_ref[...], preferred_element_type=jnp.float32)
    h = jnp.maximum(h + b1_ref[...].astype(jnp.float32), 0.0)
    # Layer 2 (mixed precision if w2 is bf16 — see header note).
    y = jnp.dot(h.astype(w2_ref.dtype), w2_ref[...],
                preferred_element_type=jnp.float32)
    y = y + b2_ref[...].astype(jnp.float32)
    o_ref[...] = y.astype(o_ref.dtype)


def _cdiv(a, b):
    return (a + b - 1) // b


def _round_up(n, m):
    return ((n + m - 1) // m) * m


def subject_wise_embedding(x, w1, b1, w2, b2, *, fold=16, tile_rows=2048):
    """x: [B, input_features] -> [B, out_features]  (Linear -> ReLU -> Linear).

    fold:      batch rows folded into the lane axis (16 -> 128-wide output when
               out_features == 8; use 8 on v5e).
    tile_rows: folded rows per grid step (batch rows per step = fold*tile_rows).
    """
    B, F = x.shape
    H = w1.shape[1]
    O = w2.shape[1]

    # ---- Fold the batch into the lane dimension (free row-major reshapes). ---
    # Block-diagonal weights / tiled biases are built once per call (< 2 MiB).
    w1_blk = jnp.kron(jnp.eye(fold, dtype=w1.dtype), w1)      # (fold*F, fold*H)
    w2_blk = jnp.kron(jnp.eye(fold, dtype=w2.dtype), w2)      # (fold*H, fold*O)
    b1_blk = jnp.tile(b1.reshape(-1), fold).reshape(1, fold * H)
    b2_blk = jnp.tile(b2.reshape(-1), fold).reshape(1, fold * O)

    # ---- Batch-tile sizing in folded rows. -----------------------------------
    folded_rows = _cdiv(B, fold)
    tile = max(8, min(tile_rows, _round_up(folded_rows, 8)))
    if folded_rows > 8:
        # Keep >= 2 grid steps when there is real work so ("parallel",) can
        # shard batch tiles across v7x's two TensorCores.
        tile = min(tile, _round_up(_cdiv(folded_rows, 2), 8))
    folded_pad = _round_up(folded_rows, tile)
    b_pad = folded_pad * fold

    if b_pad != B:
        # Padded rows pick up bias/ReLU garbage; they are sliced off below and
        # must never be aliased into a live output buffer.
        x = jnp.pad(x, ((0, b_pad - B), (0, 0)))
    x_fold = x.reshape(folded_pad, fold * F)                  # free reshape

    grid = (folded_pad // tile,)
    KF, KH, KO = fold * F, fold * H, fold * O

    itm_x = jnp.dtype(x.dtype).itemsize
    itm_w = jnp.dtype(w1.dtype).itemsize
    cost = pl.CostEstimate(
        flops=2 * b_pad * (F * H + H * O),
        transcendentals=0,
        bytes_accessed=itm_x * b_pad * (F + O)
        + itm_w * (KF * KH + KH * KO + KH + KO),
    )

    out_fold = pl.pallas_call(
        _mlp_kernel,
        out_shape=jax.ShapeDtypeStruct((folded_pad, KO), x.dtype),
        grid_spec=pltpu.PrefetchScalarGridSpec(
            num_scalar_prefetch=0,
            grid=grid,
            in_specs=[
                pl.BlockSpec((tile, KF), lambda i: (i, 0)),   # streamed x tiles
                pl.BlockSpec((KF, KH), lambda i: (0, 0)),     # VMEM-resident
                pl.BlockSpec((1, KH), lambda i: (0, 0)),      # VMEM-resident
                pl.BlockSpec((KH, KO), lambda i: (0, 0)),     # VMEM-resident
                pl.BlockSpec((1, KO), lambda i: (0, 0)),      # VMEM-resident
            ],
            out_specs=pl.BlockSpec((tile, KO), lambda i: (i, 0)),
        ),
        compiler_params=pltpu.CompilerParams(
            dimension_semantics=("parallel",),                # v7x megacore
        ),
        cost_estimate=cost,
    )(x_fold, w1_blk, b1_blk, w2_blk, b2_blk)

    out = out_fold.reshape(b_pad, O)                          # free reshape
    return out[:B] if b_pad != B else out


def init_params(key, input_features, out_features, hidden_units, dtype=jnp.float32):
    """Deterministic init mirroring nn.Linear default (uniform +/- 1/sqrt(fan_in))."""
    k1, k2, k3, k4 = jax.random.split(key, 4)
    lim1 = 1.0 / jnp.sqrt(input_features)
    lim2 = 1.0 / jnp.sqrt(hidden_units)
    w1 = jax.random.uniform(k1, (input_features, hidden_units), dtype, -lim1, lim1)
    b1 = jax.random.uniform(k2, (hidden_units,), dtype, -lim1, lim1)
    w2 = jax.random.uniform(k3, (hidden_units, out_features), dtype, -lim2, lim2)
    b2 = jax.random.uniform(k4, (out_features,), dtype, -lim2, lim2)
    return w1, b1, w2, b2


if __name__ == "__main__":
    # Small shapes consistent with the module: subject_id -> [batch, input_features]
    batch = 8
    input_features = 16
    hidden_units = 32
    out_features = 8

    key = jax.random.PRNGKey(0)
    kx, kp = jax.random.split(key)
    x = jax.random.normal(kx, (batch, input_features), jnp.float32)
    w1, b1, w2, b2 = init_params(kp, input_features, out_features, hidden_units)
    ref = jnp.maximum(x @ w1 + b1, 0.0) @ w2 + b2

    out = jax.block_until_ready(subject_wise_embedding(x, w1, b1, w2, b2))
    assert out.shape == (batch, out_features)
    assert jnp.allclose(out, ref, atol=1e-5, rtol=1e-5)

    # Batch not a multiple of the fold/tile -> exercises padding + slice-off.
    x2 = jax.random.normal(jax.random.PRNGKey(1), (37, input_features), jnp.float32)
    out2 = jax.block_until_ready(subject_wise_embedding(x2, w1, b1, w2, b2))
    ref2 = jnp.maximum(x2 @ w1 + b1, 0.0) @ w2 + b2
    assert out2.shape == (37, out_features)
    assert jnp.allclose(out2, ref2, atol=1e-5, rtol=1e-5)

    # v5e-friendly 8-row fold (K=128 -> one weight pass on the 128-wide MXU).
    out3 = jax.block_until_ready(subject_wise_embedding(x, w1, b1, w2, b2, fold=8))
    assert jnp.allclose(out3, ref, atol=1e-5, rtol=1e-5)

    print("KERNEL_OK")
</pallas_src>

<mosaic_0001>
module attributes {stable_mosaic.version = 11 : i64} {
  func.func @_mlp_kernel(%arg0: i32, %arg1: memref<8x256xf32, #tpu.memory_space<vmem>>, %arg2: memref<256x512xf32, #tpu.memory_space<vmem>>, %arg3: memref<1x512xf32, #tpu.memory_space<vmem>>, %arg4: memref<512x128xf32, #tpu.memory_space<vmem>>, %arg5: memref<1x128xf32, #tpu.memory_space<vmem>>, %arg6: memref<8x128xf32, #tpu.memory_space<vmem>>) attributes {dimension_semantics = [#tpu.dimension_semantics<parallel>], iteration_bounds = array<i64: 1>, scalar_prefetch = 0 : i64, scratch_operands = 0 : i64, tpu.core_type = #tpu.core_type<tc>, window_params = [{transform_indices = @transform_0, window_bounds = array<i64: 8, 256>}, {pipeline_mode = #tpu.pipeline_mode<synchronous>, transform_indices = @transform_1, window_bounds = array<i64: 256, 512>}, {pipeline_mode = #tpu.pipeline_mode<synchronous>, transform_indices = @transform_2, window_bounds = array<i64: 1, 512>}, {pipeline_mode = #tpu.pipeline_mode<synchronous>, transform_indices = @transform_3, window_bounds = array<i64: 512, 128>}, {pipeline_mode = #tpu.pipeline_mode<synchronous>, transform_indices = @transform_4, window_bounds = array<i64: 1, 128>}, {transform_indices = @transform_5, window_bounds = array<i64: 8, 128>}]} {
    %c0 = arith.constant 0 : index
    %c0_0 = arith.constant 0 : index
    %0 = vector.load %arg1[%c0, %c0_0] : memref<8x256xf32, #tpu.memory_space<vmem>>, vector<8x256xf32>
    %c0_1 = arith.constant 0 : index
    %c0_2 = arith.constant 0 : index
    %1 = vector.load %arg2[%c0_1, %c0_2] : memref<256x512xf32, #tpu.memory_space<vmem>>, vector<256x512xf32>
    %cst = arith.constant dense<0.000000e+00> : vector<8x512xf32>
    %2 = tpu.matmul %0, %1, %cst {dimension_numbers = #tpu.dot_dimension_numbers<[1], [0], [0], [1], [0, 0, 1, 1], [], []>} : vector<8x256xf32>, vector<256x512xf32>, vector<8x512xf32> -> vector<8x512xf32>
    %c0_3 = arith.constant 0 : index
    %c0_4 = arith.constant 0 : index
    %3 = vector.load %arg3[%c0_3, %c0_4] : memref<1x512xf32, #tpu.memory_space<vmem>>, vector<1x512xf32>
    %4 = vector.broadcast %3 : vector<1x512xf32> to vector<8x512xf32>
    %5 = arith.addf %2, %4 : vector<8x512xf32>
    %cst_5 = arith.constant 0.000000e+00 : f32
    %6 = vector.broadcast %cst_5 : f32 to vector<8x512xf32>
    %7 = arith.maximumf %5, %6 : vector<8x512xf32>
    %c0_6 = arith.constant 0 : index
    %c0_7 = arith.constant 0 : index
    %8 = vector.load %arg4[%c0_6, %c0_7] : memref<512x128xf32, #tpu.memory_space<vmem>>, vector<512x128xf32>
    %cst_8 = arith.constant dense<0.000000e+00> : vector<8x128xf32>
    %9 = tpu.matmul %7, %8, %cst_8 {dimension_numbers = #tpu.dot_dimension_numbers<[1], [0], [0], [1], [0, 0, 1, 1], [], []>} : vector<8x512xf32>, vector<512x128xf32>, vector<8x128xf32> -> vector<8x128xf32>
    %c0_9 = arith.constant 0 : index
    %c0_10 = arith.constant 0 : index
    %10 = vector.load %arg5[%c0_9, %c0_10] : memref<1x128xf32, #tpu.memory_space<vmem>>, vector<1x128xf32>
    %11 = vector.broadcast %10 : vector<1x128xf32> to vector<8x128xf32>
    %12 = arith.addf %9, %11 : vector<8x128xf32>
    %c0_11 = arith.constant 0 : index
    %c0_12 = arith.constant 0 : index
    %13 = vector.load %arg6[%c0_11, %c0_12] : memref<8x128xf32, #tpu.memory_space<vmem>>, vector<8x128xf32>
    tpu.vector_store %arg6[%c0_11, %c0_12], %12 {strides = array<i32>} : memref<8x128xf32, #tpu.memory_space<vmem>>, vector<8x128xf32>,
    return
  }
  func.func @transform_0(%arg0: i32) -> (i32, i32) {
    %c0_i32 = arith.constant 0 : i32
    %c0_i32_0 = arith.constant 0 : i32
    return %arg0, %c0_i32 : i32, i32
  }
  func.func @transform_1(%arg0: i32) -> (i32, i32) {
    %c0_i32 = arith.constant 0 : i32
    %c0_i32_0 = arith.constant 0 : i32
    %c0_i32_1 = arith.constant 0 : i32
    return %c0_i32, %c0_i32_0 : i32, i32
  }
  func.func @transform_2(%arg0: i32) -> (i32, i32) {
    %c0_i32 = arith.constant 0 : i32
    %c0_i32_0 = arith.constant 0 : i32
    %c0_i32_1 = arith.constant 0 : i32
    return %c0_i32, %c0_i32_0 : i32, i32
  }
  func.func @transform_3(%arg0: i32) -> (i32, i32) {
    %c0_i32 = arith.constant 0 : i32
    %c0_i32_0 = arith.constant 0 : i32
    %c0_i32_1 = arith.constant 0 : i32
    return %c0_i32, %c0_i32_0 : i32, i32
  }
  func.func @transform_4(%arg0: i32) -> (i32, i32) {
    %c0_i32 = arith.constant 0 : i32
    %c0_i32_0 = arith.constant 0 : i32
    %c0_i32_1 = arith.constant 0 : i32
    return %c0_i32, %c0_i32_0 : i32, i32
  }
  func.func @transform_5(%arg0: i32) -> (i32, i32) {
    %c0_i32 = arith.constant 0 : i32
    %c0_i32_0 = arith.constant 0 : i32
    return %arg0, %c0_i32 : i32, i32
  }
}

</mosaic_0001>

<bundles_post_ra>
// kernel: tpu_custom_call.1
= control target key start
LH: loop header
LB: loop body
LE: loop exit
PB: predicated region body
PF: predicated region fallthrough
CT: control target
= control target key end

     0   :  { %10 = vsyncpa [#allocation3], 0  ;;  %s1043_s0 = inlined_call_operand.hbm [shape: f32[8,256], index: 0, kind: input, shape index: {}]   ;;  %s1044_s1 = inlined_call_operand.hbm [shape: f32[256,512], index: 1, kind: input, shape index: {}]   ;;  %s1045_s2 = inlined_call_operand.vmem [shape: f32[1,512], index: 2, kind: input, shape index: {}]   ;;  %s1046_s3 = inlined_call_operand.hbm [shape: f32[512,128], index: 3, kind: input, shape index: {}]   ;;  %s1047_s4 = inlined_call_operand.vmem [shape: f32[1,128], index: 4, kind: input, shape index: {}]   ;;  %s1048_s5 = inlined_call_operand.hbm [shape: f32[8,128], index: 5, kind: output, shape index: {}]  }
   0x1   :  { %11 = vsyncpa [#allocation6], 0 }
   0x2   :  { %12 = vsyncpa [#allocation4], 0  ;;  %s951_s18 = smov [#allocation5]   ;;  %s857_s22 = scalar_lea.hbm %s1044_s1, 16384 }
   0x3   :  { %s28_s19 = sshll.u32 %s951_s18, 4  ;;  %p858_p0 = scmp.ne.s32.totalorder %s1044_s1, %s857_s22  ;;  %s29_s19 = int_to_ptr.vmem [resolvable:$true] %s28_s19 }
   0x4   :  { %p861_p1 = scmp.lt.u32.totalorder %s857_s22, %s1044_s1 }
   0x6   :  { %p863_p2 = pnand %p861_p1, %p858_p0 }
   0x8   :  { %866 = shalt.err (!%p863_p2)
}
   0x9   :  { %s867_s27 = scalar_lea.vmem %s29_s19, 16384  ;;  %p872_p4 = scmp.lt.s32.totalorder %s29_s19, %s29_s19 }
   0xa   :  { %p868_p3 = scmp.ne.s32.totalorder %s29_s19, %s867_s27  ;;  %p873_p5 = scmp.lt.s32.totalorder %s867_s27, %s867_s27 }
   0xc   :  { %p874_p6 = por %p873_p5, %p872_p4 }
   0xe   :  { %p875_p7 = pnand %p874_p6, %p868_p3 }
  0x10   :  { %878 = shalt.err (!%p875_p7)
}
  0x11   :  { %s952_s28 = smov 512   ;;  %s953_s29 = smov 32  }
  0x12   :  { %34 = dma.hbm_to_vmem [thread:$0]  %s1044_s1, 16384, %s29_s19, [#allocation6], %s952_s28, %s952_s28, %s953_s29  }
  0x13   :  { %s954_s7 = smov [#allocation2]   ;;  %s955_s9 = smov [#allocation7]  }
  0x14   :  { %s19_s8 = sshll.u32 %s954_s7, 4  ;;  %s42_s10 = sshll.u32 %s955_s9, 4  ;;  %s20_s8 = int_to_ptr.vmem [resolvable:$true] %s19_s8  ;;  %s43_s10 = int_to_ptr.vmem [resolvable:$true] %s42_s10 }
  0x15   :  { %s879_s13 = scalar_lea.hbm %s1043_s0, 256 }
  0x16   :  { %p880_p8 = scmp.ne.s32.totalorder %s1043_s0, %s879_s13  ;;  %p883_p9 = scmp.lt.u32.totalorder %s879_s13, %s1043_s0 }
  0x18   :  { %p885_p10 = pnand %p883_p9, %p880_p8 }
  0x1a   :  { %888 = shalt.err (!%p885_p10)
}
  0x1b   :  { %s889_s1 = scalar_lea.vmem %s20_s8, 256  ;;  %p894_p12 = scmp.lt.s32.totalorder %s20_s8, %s20_s8 }
  0x1c   :  { %p890_p11 = scmp.ne.s32.totalorder %s20_s8, %s889_s1  ;;  %p895_p13 = scmp.lt.s32.totalorder %s889_s1, %s889_s1 }
  0x1e   :  { %p896_p0 = por %p895_p13, %p894_p12 }
  0x20   :  { %p897_p1 = pnand %p896_p0, %p890_p11 }
  0x22   :  { %900 = shalt.err (!%p897_p1)
}
  0x23   :  { %22 = dma.hbm_to_vmem [thread:$0]  %s1043_s0, 256, %s20_s8, [#allocation3]  }
  0x24   :  { %s901_s22 = scalar_lea.hbm %s1046_s3, 8192 }
  0x25   :  { %p902_p2 = scmp.ne.s32.totalorder %s1046_s3, %s901_s22  ;;  %p905_p3 = scmp.lt.u32.totalorder %s901_s22, %s1046_s3 }
  0x27   :  { %p907_p4 = pnand %p905_p3, %p902_p2 }
  0x29   :  { %910 = shalt.err (!%p907_p4)
}
  0x2a   :  { %s911_s27 = scalar_lea.vmem %s43_s10, 8192  ;;  %p916_p6 = scmp.lt.s32.totalorder %s43_s10, %s43_s10 }
  0x2b   :  { %p912_p5 = scmp.ne.s32.totalorder %s43_s10, %s911_s27  ;;  %p917_p7 = scmp.lt.s32.totalorder %s911_s27, %s911_s27 }
  0x2d   :  { %p918_p8 = por %p917_p7, %p916_p6 }
  0x2f   :  { %p919_p9 = pnand %p918_p8, %p912_p5 }
  0x31   :  { %922 = shalt.err (!%p919_p9)
}
  0x32   :  { %s956_s0 = smov 128   ;;  %s957_s28 = smov 8  }
  0x33   :  { %48 = dma.hbm_to_vmem [thread:$0]  %s1046_s3, 8192, %s43_s10, [#allocation6], %s956_s0, %s956_s0, %s957_s28  }
  0x34   :  { %945 = dma.done.wait [#allocation3], 256  }
  0x35   :  { %946 = vsyncadd [#allocation3], 4294967040 }
  0x36   :  { %947 = dma.done.wait [#allocation6], 24576  }
  0x37   :  { %948 = vsyncadd [#allocation6], 4294942720  ;;  %v63_v0 = vld [vmem:[#allocation5 + $0x8] sm:$0xff]  ;;  %v65_v2 = vld [vmem:[#allocation5 + $0x18] sm:$0xff]  ;;  %s958_s8 = smov [#allocation8]  }
  0x38   :  { %v67_v1 = vld [vmem:[#allocation5 + $0x28] sm:$0xff]  ;;  %v69_v4 = vld [vmem:[#allocation5 + $0x38] sm:$0xff]  ;;  %v62_v5 = vld [vmem:[#allocation5] sm:$0xff]  ;;  %s576_s9 = sshll.u32 %s958_s8, 4  ;;  %s577_s9 = int_to_ptr.vmem [resolvable:$true] %s576_s9 }
  0x39   :  { %v657_v3 = vpack.c.bf16 %v67_v1, %v63_v0  ;;  %v66_v6 = vld [vmem:[#allocation5 + $0x20] sm:$0xff]  ;;  %v721_v7 = vpack.c.bf16 %v69_v4, %v65_v2  ;;  %v64_v9 = vld [vmem:[#allocation5 + $0x10] sm:$0xff]  ;;  %v71_v11 = vld [vmem:[#allocation5 + $0x48] sm:$0xff]  ;;  %s923_s10 = scalar_lea.vmem %s577_s9, 128  ;;  %p928_p11 = scmp.lt.s32.totalorder %s577_s9, %s577_s9 }
  0x3a   :  { %v659_v8 = vpack.c.bf16 %v66_v6, %v62_v5  ;;  %v68_v10 = vld [vmem:[#allocation5 + $0x30] sm:$0xff]  ;;  %v75_v13 = vld [vmem:[#allocation5 + $0x68] sm:$0xff]  ;;  %v73_v14 = vld [vmem:[#allocation5 + $0x58] sm:$0xff]  ;;  %p924_p10 = scmp.ne.s32.totalorder %s577_s9, %s923_s10  ;;  %p929_p12 = scmp.lt.s32.totalorder %s923_s10, %s923_s10 }
  0x3b   :  { %658 = vmatprep.subr.bf16.mxu0 %v657_v3  ;;  %v723_v12 = vpack.c.bf16 %v68_v10, %v64_v9  ;;  %v77_v15 = vld [vmem:[#allocation5 + $0x78] sm:$0xff]  ;;  %722 = vmatprep.subr.bf16.mxu1 %v721_v7  ;;  %v661_v16 = vpack.c.bf16 %v75_v13, %v71_v11  ;;  %v70_v18 = vld [vmem:[#allocation5 + $0x40] sm:$0xff]  ;;  %v72_v20 = vld [vmem:[#allocation5 + $0x50] sm:$0xff] }
  0x3c   :  { %660 = vmatpush1.bf16.msra.mxu0 %v659_v8  ;;  %v725_v17 = vpack.c.bf16 %v77_v15, %v73_v14  ;;  %v74_v19 = vld [vmem:[#allocation5 + $0x60] sm:$0xff]  ;;  %v76_v22 = vld [vmem:[#allocation5 + $0x70] sm:$0xff]  ;;  %v79_v23 = vld [vmem:[#allocation5 + $0x88] sm:$0xff]  ;;  %p930_p13 = por %p929_p12, %p928_p11 }
  0x3d   :  { %724 = vmatpush1.bf16.msra.mxu1 %v723_v12  ;;  %v663_v21 = vpack.c.bf16 %v74_v19, %v70_v18  ;;  %v83_v24 = vld [vmem:[#allocation5 + $0xa8] sm:$0xff]  ;;  %662 = vmatprep.subr.bf16.mxu0 %v661_v16  ;;  %v727_v25 = vpack.c.bf16 %v76_v22, %v72_v20  ;;  %v81_v27 = vld [vmem:[#allocation5 + $0x98] sm:$0xff]  ;;  %v78_v29 = vld [vmem:[#allocation5 + $0x80] sm:$0xff] }
  0x3e   :  { %726 = vmatprep.subr.bf16.mxu1 %v725_v17  ;;  %v665_v26 = vpack.c.bf16 %v83_v24, %v79_v23  ;;  %v85_v28 = vld [vmem:[#allocation5 + $0xb8] sm:$0xff]  ;;  %v82_v31 = vld [vmem:[#allocation5 + $0xa0] sm:$0xff]  ;;  %v80_v32 = vld [vmem:[#allocation5 + $0x90] sm:$0xff]  ;;  %p931_p0 = pnand %p930_p13, %p924_p10 }
  0x3f   :  { %v729_v30 = vpack.c.bf16 %v85_v28, %v81_v27  ;;  %v84_v33 = vld [vmem:[#allocation5 + $0xb0] sm:$0xff]  ;;  %v667_v34 = vpack.c.bf16 %v82_v31, %v78_v29  ;;  %v87_v35 = vld [vmem:[#allocation5 + $0xc8] sm:$0xff]  ;;  %v89_v37 = vld [vmem:[#allocation5 + $0xd8] sm:$0xff] }
  0x40   :  { %664 = vmatpush1.bf16.msra.mxu0 %v663_v21  ;;  %v91_v36 = vld [vmem:[#allocation5 + $0xe8] sm:$0xff]  ;;  %v731_v38 = vpack.c.bf16 %v84_v33, %v80_v32  ;;  %v93_v40 = vld [vmem:[#allocation5 + $0xf8] sm:$0xff]  ;;  %v86_v41 = vld [vmem:[#allocation5 + $0xc0] sm:$0xff] }
  0x41   :  { %728 = vmatpush1.bf16.msra.mxu1 %v727_v25  ;;  %666 = vmatprep.subr.bf16.mxu0 %v665_v26  ;;  %v669_v39 = vpack.c.bf16 %v91_v36, %v87_v35  ;;  %v90_v42 = vld [vmem:[#allocation5 + $0xe0] sm:$0xff]  ;;  %v733_v43 = vpack.c.bf16 %v93_v40, %v89_v37  ;;  %v88_v44 = vld [vmem:[#allocation5 + $0xd0] sm:$0xff]  ;;  %v95_v46 = vld [vmem:[#allocation5 + $0x108] sm:$0xff] }
  0x42   :  { %730 = vmatprep.subr.bf16.mxu1 %v729_v30  ;;  %v92_v45 = vld [vmem:[#allocation5 + $0xf0] sm:$0xff]  ;;  %v99_v47 = vld [vmem:[#allocation5 + $0x128] sm:$0xff]  ;;  %v97_v48 = vld [vmem:[#allocation5 + $0x118] sm:$0xff]  ;;  %v671_v50 = vpack.c.bf16 %v90_v42, %v86_v41 }
  0x43   :  { %v101_v49 = vld [vmem:[#allocation5 + $0x138] sm:$0xff]  ;;  %v735_v51 = vpack.c.bf16 %v92_v45, %v88_v44  ;;  %v673_v52 = vpack.c.bf16 %v99_v47, %v95_v46  ;;  %v94_v53 = vld [vmem:[#allocation5 + $0x100] sm:$0xff]  ;;  %v96_v55 = vld [vmem:[#allocation5 + $0x110] sm:$0xff] }
  0x44   :  { %668 = vmatpush1.bf16.msra.mxu0 %v667_v34  ;;  %v98_v54 = vld [vmem:[#allocation5 + $0x120] sm:$0xff]  ;;  %v737_v56 = vpack.c.bf16 %v101_v49, %v97_v48  ;;  %v100_v57 = vld [vmem:[#allocation5 + $0x130] sm:$0xff]  ;;  %v103_v58 = vld [vmem:[#allocation5 + $0x148] sm:$0xff] }
  0x45   :  { %732 = vmatpush1.bf16.msra.mxu1 %v731_v38  ;;  %670 = vmatprep.subr.bf16.mxu0 %v669_v39  ;;  %v107_v59 = vld [vmem:[#allocation5 + $0x168] sm:$0xff]  ;;  %v105_v60 = vld [vmem:[#allocation5 + $0x158] sm:$0xff]  ;;  %v675_v62 = vpack.c.bf16 %v98_v54, %v94_v53  ;;  %v739_v63 = vpack.c.bf16 %v100_v57, %v96_v55  ;;  %v102_v1 = vld [vmem:[#allocation5 + $0x140] sm:$0xff] }
  0x46   :  { %734 = vmatprep.subr.bf16.mxu1 %v733_v43  ;;  %v109_v61 = vld [vmem:[#allocation5 + $0x178] sm:$0xff]  ;;  %v677_v0 = vpack.c.bf16 %v107_v59, %v103_v58  ;;  %v106_v2 = vld [vmem:[#allocation5 + $0x160] sm:$0xff]  ;;  %v104_v3 = vld [vmem:[#allocation5 + $0x150] sm:$0xff] }
  0x47   :  { %v741_v4 = vpack.c.bf16 %v109_v61, %v105_v60  ;;  %v108_v5 = vld [vmem:[#allocation5 + $0x170] sm:$0xff]  ;;  %v111_v6 = vld [vmem:[#allocation5 + $0x188] sm:$0xff]  ;;  %v113_v8 = vld [vmem:[#allocation5 + $0x198] sm:$0xff]  ;;  %v679_v10 = vpack.c.bf16 %v106_v2, %v102_v1 }
  0x48   :  { %672 = vmatpush1.bf16.msra.mxu0 %v671_v50  ;;  %v115_v7 = vld [vmem:[#allocation5 + $0x1a8] sm:$0xff]  ;;  %v117_v9 = vld [vmem:[#allocation5 + $0x1b8] sm:$0xff]  ;;  %v743_v11 = vpack.c.bf16 %v108_v5, %v104_v3  ;;  %v110_v13 = vld [vmem:[#allocation5 + $0x180] sm:$0xff] }
  0x49   :  { %736 = vmatpush1.bf16.msra.mxu1 %v735_v51  ;;  %674 = vmatprep.subr.bf16.mxu0 %v673_v52  ;;  %v681_v12 = vpack.c.bf16 %v115_v7, %v111_v6  ;;  %v114_v14 = vld [vmem:[#allocation5 + $0x1a0] sm:$0xff]  ;;  %v112_v15 = vld [vmem:[#allocation5 + $0x190] sm:$0xff]  ;;  %v745_v16 = vpack.c.bf16 %v117_v9, %v113_v8  ;;  %v119_v18 = vld [vmem:[#allocation5 + $0x1c8] sm:$0xff] }
  0x4a   :  { %738 = vmatprep.subr.bf16.mxu1 %v737_v56  ;;  %v116_v17 = vld [vmem:[#allocation5 + $0x1b0] sm:$0xff]  ;;  %v123_v19 = vld [vmem:[#allocation5 + $0x1e8] sm:$0xff]  ;;  %v121_v20 = vld [vmem:[#allocation5 + $0x1d8] sm:$0xff]  ;;  %v683_v22 = vpack.c.bf16 %v114_v14, %v110_v13 }
  0x4b   :  { %v125_v21 = vld [vmem:[#allocation5 + $0x1f8] sm:$0xff]  ;;  %v747_v23 = vpack.c.bf16 %v116_v17, %v112_v15  ;;  %v685_v24 = vpack.c.bf16 %v123_v19, %v119_v18  ;;  %v118_v25 = vld [vmem:[#allocation5 + $0x1c0] sm:$0xff]  ;;  %v120_v27 = vld [vmem:[#allocation5 + $0x1d0] sm:$0xff] }
  0x4c   :  { %676 = vmatpush1.bf16.msra.mxu0 %v675_v62  ;;  %v122_v26 = vld [vmem:[#allocation5 + $0x1e0] sm:$0xff]  ;;  %v749_v28 = vpack.c.bf16 %v125_v21, %v121_v20  ;;  %v124_v29 = vld [vmem:[#allocation5 + $0x1f0] sm:$0xff]  ;;  %v127_v30 = vld [vmem:[#allocation5 + $0x208] sm:$0xff] }
  0x4d   :  { %740 = vmatpush1.bf16.msra.mxu1 %v739_v63  ;;  %678 = vmatprep.subr.bf16.mxu0 %v677_v0  ;;  %v131_v31 = vld [vmem:[#allocation5 + $0x228] sm:$0xff]  ;;  %v129_v32 = vld [vmem:[#allocation5 + $0x218] sm:$0xff]  ;;  %v687_v34 = vpack.c.bf16 %v122_v26, %v118_v25  ;;  %v751_v35 = vpack.c.bf16 %v124_v29, %v120_v27  ;;  %v126_v37 = vld [vmem:[#allocation5 + $0x200] sm:$0xff] }
  0x4e   :  { %742 = vmatprep.subr.bf16.mxu1 %v741_v4  ;;  %v133_v33 = vld [vmem:[#allocation5 + $0x238] sm:$0xff]  ;;  %v689_v36 = vpack.c.bf16 %v131_v31, %v127_v30  ;;  %v130_v38 = vld [vmem:[#allocation5 + $0x220] sm:$0xff]  ;;  %v128_v39 = vld [vmem:[#allocation5 + $0x210] sm:$0xff] }
  0x4f   :  { %v753_v40 = vpack.c.bf16 %v133_v33, %v129_v32  ;;  %v132_v41 = vld [vmem:[#allocation5 + $0x230] sm:$0xff]  ;;  %v135_v42 = vld [vmem:[#allocation5 + $0x248] sm:$0xff]  ;;  %v137_v44 = vld [vmem:[#allocation5 + $0x258] sm:$0xff]  ;;  %v691_v46 = vpack.c.bf16 %v130_v38, %v126_v37 }
  0x50   :  { %680 = vmatpush1.bf16.msra.mxu0 %v679_v10  ;;  %v139_v43 = vld [vmem:[#allocation5 + $0x268] sm:$0xff]  ;;  %v141_v45 = vld [vmem:[#allocation5 + $0x278] sm:$0xff]  ;;  %v755_v47 = vpack.c.bf16 %v132_v41, %v128_v39  ;;  %v134_v49 = vld [vmem:[#allocation5 + $0x240] sm:$0xff] }
  0x51   :  { %744 = vmatpush1.bf16.msra.mxu1 %v743_v11  ;;  %682 = vmatprep.subr.bf16.mxu0 %v681_v12  ;;  %v693_v48 = vpack.c.bf16 %v139_v43, %v135_v42  ;;  %v138_v50 = vld [vmem:[#allocation5 + $0x260] sm:$0xff]  ;;  %v136_v51 = vld [vmem:[#allocation5 + $0x250] sm:$0xff]  ;;  %v757_v52 = vpack.c.bf16 %v141_v45, %v137_v44  ;;  %v143_v54 = vld [vmem:[#allocation5 + $0x288] sm:$0xff] }
  0x52   :  { %746 = vmatprep.subr.bf16.mxu1 %v745_v16  ;;  %v140_v53 = vld [vmem:[#allocation5 + $0x270] sm:$0xff]  ;;  %v147_v55 = vld [vmem:[#allocation5 + $0x2a8] sm:$0xff]  ;;  %v145_v56 = vld [vmem:[#allocation5 + $0x298] sm:$0xff]  ;;  %v695_v58 = vpack.c.bf16 %v138_v50, %v134_v49 }
  0x53   :  { %v149_v57 = vld [vmem:[#allocation5 + $0x2b8] sm:$0xff]  ;;  %v759_v59 = vpack.c.bf16 %v140_v53, %v136_v51  ;;  %v697_v60 = vpack.c.bf16 %v147_v55, %v143_v54  ;;  %v142_v61 = vld [vmem:[#allocation5 + $0x280] sm:$0xff]  ;;  %v144_v63 = vld [vmem:[#allocation5 + $0x290] sm:$0xff] }
  0x54   :  { %684 = vmatpush1.bf16.msra.mxu0 %v683_v22  ;;  %v146_v62 = vld [vmem:[#allocation5 + $0x2a0] sm:$0xff]  ;;  %v761_v0 = vpack.c.bf16 %v149_v57, %v145_v56  ;;  %v148_v1 = vld [vmem:[#allocation5 + $0x2b0] sm:$0xff]  ;;  %v151_v2 = vld [vmem:[#allocation5 + $0x2c8] sm:$0xff] }
  0x55   :  { %748 = vmatpush1.bf16.msra.mxu1 %v747_v23  ;;  %686 = vmatprep.subr.bf16.mxu0 %v685_v24  ;;  %v155_v3 = vld [vmem:[#allocation5 + $0x2e8] sm:$0xff]  ;;  %v153_v4 = vld [vmem:[#allocation5 + $0x2d8] sm:$0xff]  ;;  %v699_v6 = vpack.c.bf16 %v146_v62, %v142_v61  ;;  %v150_v7 = vld [vmem:[#allocation5 + $0x2c0] sm:$0xff]  ;;  %v763_v8 = vpack.c.bf16 %v148_v1, %v144_v63 }
  0x56   :  { %750 = vmatprep.subr.bf16.mxu1 %v749_v28  ;;  %v157_v5 = vld [vmem:[#allocation5 + $0x2f8] sm:$0xff]  ;;  %v701_v9 = vpack.c.bf16 %v155_v3, %v151_v2  ;;  %v154_v10 = vld [vmem:[#allocation5 + $0x2e0] sm:$0xff]  ;;  %v152_v11 = vld [vmem:[#allocation5 + $0x2d0] sm:$0xff] }
  0x57   :  { %v156_v12 = vld [vmem:[#allocation5 + $0x2f0] sm:$0xff]  ;;  %v765_v13 = vpack.c.bf16 %v157_v5, %v153_v4  ;;  %v159_v14 = vld [vmem:[#allocation5 + $0x308] sm:$0xff]  ;;  %v61_v16 = vld [vmem:[#allocation2 + $0x8] sm:$0xff]  ;;  %v703_v19 = vpack.c.bf16 %v154_v10, %v150_v7 }
  0x58   :  { %688 = vmatpush1.bf16.msra.mxu0 %v687_v34  ;;  %v163_v15 = vld [vmem:[#allocation5 + $0x328] sm:$0xff]  ;;  %v161_v17 = vld [vmem:[#allocation5 + $0x318] sm:$0xff]  ;;  %276 = vmatprep.mubr.f32.mxu0 %v61_v16  ;;  %v767_v20 = vpack.c.bf16 %v156_v12, %v152_v11  ;;  %v158_v22 = vld [vmem:[#allocation5 + $0x300] sm:$0xff] }
  0x59   :  { %752 = vmatpush1.bf16.msra.mxu1 %v751_v35  ;;  %690 = vmatprep.subr.bf16.mxu0 %v689_v36  ;;  %v165_v18 = vld [vmem:[#allocation5 + $0x338] sm:$0xff]  ;;  %v705_v21 = vpack.c.bf16 %v163_v15, %v159_v14  ;;  %v162_v23 = vld [vmem:[#allocation5 + $0x320] sm:$0xff]  ;;  %v160_v24 = vld [vmem:[#allocation5 + $0x310] sm:$0xff] }
  0x5a   :  { %754 = vmatprep.subr.bf16.mxu1 %v753_v40  ;;  %347 = vmatprep.mubr.f32.mxu1 %v61_v16  ;;  %v769_v25 = vpack.c.bf16 %v165_v18, %v161_v17  ;;  %v164_v26 = vld [vmem:[#allocation5 + $0x330] sm:$0xff]  ;;  %v167_v27 = vld [vmem:[#allocation5 + $0x348] sm:$0xff]  ;;  %v169_v29 = vld [vmem:[#allocation5 + $0x358] sm:$0xff]  ;;  %v707_v31 = vpack.c.bf16 %v162_v23, %v158_v22 }
  0x5b   :  { %v171_v28 = vld [vmem:[#allocation5 + $0x368] sm:$0xff]  ;;  %v173_v30 = vld [vmem:[#allocation5 + $0x378] sm:$0xff]  ;;  %v771_v32 = vpack.c.bf16 %v164_v26, %v160_v24  ;;  %v166_v34 = vld [vmem:[#allocation5 + $0x340] sm:$0xff] }
  0x5c   :  { %692 = vmatpush1.bf16.msra.mxu0 %v691_v46  ;;  %v709_v33 = vpack.c.bf16 %v171_v28, %v167_v27  ;;  %v170_v35 = vld [vmem:[#allocation5 + $0x360] sm:$0xff]  ;;  %v168_v36 = vld [vmem:[#allocation5 + $0x350] sm:$0xff]  ;;  %v773_v37 = vpack.c.bf16 %v173_v30, %v169_v29  ;;  %v175_v39 = vld [vmem:[#allocation5 + $0x388] sm:$0xff] }
  0x5d   :  { %756 = vmatpush1.bf16.msra.mxu1 %v755_v47  ;;  %694 = vmatprep.subr.bf16.mxu0 %v693_v48  ;;  %v172_v38 = vld [vmem:[#allocation5 + $0x370] sm:$0xff]  ;;  %v179_v40 = vld [vmem:[#allocation5 + $0x3a8] sm:$0xff]  ;;  %v177_v41 = vld [vmem:[#allocation5 + $0x398] sm:$0xff]  ;;  %v711_v43 = vpack.c.bf16 %v170_v35, %v166_v34 }
  0x5e   :  { %758 = vmatprep.subr.bf16.mxu1 %v757_v52  ;;  %v181_v42 = vld [vmem:[#allocation5 + $0x3b8] sm:$0xff]  ;;  %v775_v44 = vpack.c.bf16 %v172_v38, %v168_v36  ;;  %v713_v45 = vpack.c.bf16 %v179_v40, %v175_v39  ;;  %v174_v46 = vld [vmem:[#allocation5 + $0x380] sm:$0xff]  ;;  %v176_v48 = vld [vmem:[#allocation5 + $0x390] sm:$0xff] }
  0x5f   :  { %v178_v47 = vld [vmem:[#allocation5 + $0x3a0] sm:$0xff]  ;;  %v777_v49 = vpack.c.bf16 %v181_v42, %v177_v41  ;;  %v180_v50 = vld [vmem:[#allocation5 + $0x3b0] sm:$0xff]  ;;  %v183_v51 = vld [vmem:[#allocation5 + $0x3c8] sm:$0xff] }
  0x60   :  { %696 = vmatpush1.bf16.msra.mxu0 %v695_v58  ;;  %v187_v52 = vld [vmem:[#allocation5 + $0x3e8] sm:$0xff]  ;;  %v185_v53 = vld [vmem:[#allocation5 + $0x3d8] sm:$0xff]  ;;  %v715_v55 = vpack.c.bf16 %v178_v47, %v174_v46  ;;  %v779_v56 = vpack.c.bf16 %v180_v50, %v176_v48  ;;  %v182_v58 = vld [vmem:[#allocation5 + $0x3c0] sm:$0xff] }
  0x61   :  { %760 = vmatpush1.bf16.msra.mxu1 %v759_v59  ;;  %698 = vmatprep.subr.bf16.mxu0 %v697_v60  ;;  %v189_v54 = vld [vmem:[#allocation5 + $0x3f8] sm:$0xff]  ;;  %v717_v57 = vpack.c.bf16 %v187_v52, %v183_v51  ;;  %v186_v59 = vld [vmem:[#allocation5 + $0x3e0] sm:$0xff]  ;;  %v184_v60 = vld [vmem:[#allocation5 + $0x3d0] sm:$0xff] }
  0x62   :  { %762 = vmatprep.subr.bf16.mxu1 %v761_v0  ;;  %v781_v61 = vpack.c.bf16 %v189_v54, %v185_v53  ;;  %v188_v62 = vld [vmem:[#allocation5 + $0x3f0] sm:$0xff]  ;;  %v374_v63 = vld [vmem:[#allocation7 + $0x80] sm:$0xff]  ;;  %v375_v0 = vld [vmem:[#allocation7 + $0x88] sm:$0xff]  ;;  %v719_v3 = vpack.c.bf16 %v186_v59, %v182_v58 }
  0x63   :  { %v406_v1 = vld [vmem:[#allocation7 + $0x180] sm:$0xff]  ;;  %v407_v2 = vld [vmem:[#allocation7 + $0x188] sm:$0xff]  ;;  %v783_v4 = vpack.c.bf16 %v188_v62, %v184_v60  ;;  %v785_v5 = vpack.c.bf16 %v375_v0, %v374_v63  ;;  %v376_v11 = vld [vmem:[#allocation7 + $0x90] sm:$0xff] }
  0x64   :  { %700 = vmatpush1.bf16.msra.mxu0 %v699_v6  ;;  %v358_v6 = vld [vmem:[#allocation7] sm:$0xff]  ;;  %v359_v7 = vld [vmem:[#allocation7 + $0x8] sm:$0xff]  ;;  %v377_v12 = vld [vmem:[#allocation7 + $0x98] sm:$0xff] }
  0x65   :  { %764 = vmatpush1.bf16.msra.mxu1 %v763_v8  ;;  %702 = vmatprep.subr.bf16.mxu0 %v701_v9  ;;  %v390_v8 = vld [vmem:[#allocation7 + $0x100] sm:$0xff]  ;;  %v817_v9 = vpack.c.bf16 %v407_v2, %v406_v1  ;;  %v391_v10 = vld [vmem:[#allocation7 + $0x108] sm:$0xff]  ;;  %v409_v14 = vld [vmem:[#allocation7 + $0x198] sm:$0xff]  ;;  %v787_v16 = vpack.c.bf16 %v359_v7, %v358_v6  ;;  %v789_v18 = vpack.c.bf16 %v377_v12, %v376_v11 }
  0x66   :  { %766 = vmatprep.subr.bf16.mxu1 %v765_v13  ;;  %v408_v13 = vld [vmem:[#allocation7 + $0x190] sm:$0xff]  ;;  %v819_v17 = vpack.c.bf16 %v391_v10, %v390_v8  ;;  %v393_v23 = vld [vmem:[#allocation7 + $0x118] sm:$0xff]  ;;  %v378_v24 = vld [vmem:[#allocation7 + $0xa0] sm:$0xff] }
  0x67   :  { %v60_v15 = vld [vmem:[#allocation2] sm:$0xff]  ;;  %v821_v22 = vpack.c.bf16 %v409_v14, %v408_v13  ;;  %v410_v26 = vld [vmem:[#allocation7 + $0x1a0] sm:$0xff]  ;;  %v411_v27 = vld [vmem:[#allocation7 + $0x1a8] sm:$0xff] }
  0x68   :  { %704 = vmatpush1.bf16.msra.mxu0 %v703_v19  ;;  %v360_v19 = vld [vmem:[#allocation7 + $0x10] sm:$0xff]  ;;  %v825_v34 = vpack.c.bf16 %v411_v27, %v410_v26  ;;  %v395_v35 = vld [vmem:[#allocation7 + $0x128] sm:$0xff]  ;;  %v413_v39 = vld [vmem:[#allocation7 + $0x1b8] sm:$0xff] }
  0x69   :  { %768 = vmatpush1.bf16.msra.mxu1 %v767_v20  ;;  %706 = vmatprep.subr.bf16.mxu0 %v705_v21  ;;  %v361_v20 = vld [vmem:[#allocation7 + $0x18] sm:$0xff]  ;;  %v392_v21 = vld [vmem:[#allocation7 + $0x110] sm:$0xff]  ;;  %v382_v48 = vld [vmem:[#allocation7 + $0xc0] sm:$0xff] }
  0x6a   :  { %770 = vmatprep.subr.bf16.mxu1 %v769_v25  ;;  %v379_v25 = vld [vmem:[#allocation7 + $0xa8] sm:$0xff]  ;;  %v791_v28 = vpack.c.bf16 %v361_v20, %v360_v19  ;;  %v823_v29 = vpack.c.bf16 %v393_v23, %v392_v21  ;;  %v380_v36 = vld [vmem:[#allocation7 + $0xb0] sm:$0xff]  ;;  %v397_v47 = vld [vmem:[#allocation7 + $0x138] sm:$0xff] }
  0x6b   :  { %v793_v30 = vpack.c.bf16 %v379_v25, %v378_v24  ;;  %v412_v38 = vld [vmem:[#allocation7 + $0x1b0] sm:$0xff]  ;;  %v414_v50 = vld [vmem:[#allocation7 + $0x1c0] sm:$0xff]  ;;  %v415_v51 = vld [vmem:[#allocation7 + $0x1c8] sm:$0xff] }
  0x6c   :  { %708 = vmatpush1.bf16.msra.mxu0 %v707_v31  ;;  %v362_v31 = vld [vmem:[#allocation7 + $0x20] sm:$0xff]  ;;  %v829_v46 = vpack.c.bf16 %v413_v39, %v412_v38  ;;  %v833_v58 = vpack.c.bf16 %v415_v51, %v414_v50  ;;  %v399_v59 = vld [vmem:[#allocation7 + $0x148] sm:$0xff]  ;;  %v384_v60 = vld [vmem:[#allocation7 + $0xd0] sm:$0xff] }
  0x6d   :  { %772 = vmatpush1.bf16.msra.mxu1 %v771_v32  ;;  %710 = vmatprep.subr.bf16.mxu0 %v709_v33  ;;  %v363_v32 = vld [vmem:[#allocation7 + $0x28] sm:$0xff]  ;;  %v394_v33 = vld [vmem:[#allocation7 + $0x120] sm:$0xff]  ;;  %v416_v62 = vld [vmem:[#allocation7 + $0x1d0] sm:$0xff] }
  0x6e   :  { %774 = vmatprep.subr.bf16.mxu1 %v773_v37  ;;  %v381_v37 = vld [vmem:[#allocation7 + $0xb8] sm:$0xff]  ;;  %v795_v40 = vpack.c.bf16 %v363_v32, %v362_v31  ;;  %v827_v41 = vpack.c.bf16 %v395_v35, %v394_v33  ;;  %v386_v8 = vld [vmem:[#allocation7 + $0xe0] sm:$0xff]  ;;  %v419_v11 = vld [vmem:[#allocation7 + $0x1e8] sm:$0xff] }
  0x6f   :  { %v797_v42 = vpack.c.bf16 %v381_v37, %v380_v36  ;;  %v417_v63 = vld [vmem:[#allocation7 + $0x1d8] sm:$0xff]  ;;  %v418_v10 = vld [vmem:[#allocation7 + $0x1e0] sm:$0xff]  ;;  %v403_v20 = vld [vmem:[#allocation7 + $0x168] sm:$0xff] }
  0x70   :  { %712 = vmatpush1.bf16.msra.mxu0 %v711_v43  ;;  %v364_v43 = vld [vmem:[#allocation7 + $0x30] sm:$0xff]  ;;  %v837_v6 = vpack.c.bf16 %v417_v63, %v416_v62  ;;  %v401_v7 = vld [vmem:[#allocation7 + $0x158] sm:$0xff] }
  0x71   :  { %776 = vmatpush1.bf16.msra.mxu1 %v775_v44  ;;  %714 = vmatprep.subr.bf16.mxu0 %v713_v45  ;;  %v365_v44 = vld [vmem:[#allocation7 + $0x38] sm:$0xff]  ;;  %v396_v45 = vld [vmem:[#allocation7 + $0x130] sm:$0xff] }
  0x72   :  { %778 = vmatprep.subr.bf16.mxu1 %v777_v49  ;;  %v383_v49 = vld [vmem:[#allocation7 + $0xc8] sm:$0xff]  ;;  %v799_v52 = vpack.c.bf16 %v365_v44, %v364_v43  ;;  %v831_v53 = vpack.c.bf16 %v397_v47, %v396_v45  ;;  %v389_v23 = vld [vmem:[#allocation7 + $0xf8] sm:$0xff]  ;;  %v420_v24 = vld [vmem:[#allocation7 + $0x1f0] sm:$0xff] }
  0x73   :  { %v801_v54 = vpack.c.bf16 %v383_v49, %v382_v48  ;;  %v421_v26 = vld [vmem:[#allocation7 + $0x1f8] sm:$0xff]  ;;  %v372_v27 = vld [vmem:[#allocation7 + $0x70] sm:$0xff] }
  0x74   :  { %716 = vmatpush1.bf16.msra.mxu0 %v715_v55  ;;  %v366_v55 = vld [vmem:[#allocation7 + $0x40] sm:$0xff]  ;;  %v404_v31 = vld [vmem:[#allocation7 + $0x170] sm:$0xff]  ;;  %v405_v32 = vld [vmem:[#allocation7 + $0x178] sm:$0xff] }
  0x75   :  { %780 = vmatpush1.bf16.msra.mxu1 %v779_v56  ;;  %718 = vmatprep.subr.bf16.mxu0 %v717_v57  ;;  %v367_v56 = vld [vmem:[#allocation7 + $0x48] sm:$0xff]  ;;  %v398_v57 = vld [vmem:[#allocation7 + $0x140] sm:$0xff]  ;;  %v847_v33 = vpack.c.bf16 %v405_v32, %v404_v31  ;;  %v190_v37 = vld [vmem:[%s1045_s2] sm:$0xf] }
  0x76   :  { %782 = vmatprep.subr.bf16.mxu1 %v781_v61  ;;  %v385_v61 = vld [vmem:[#allocation7 + $0xd8] sm:$0xff]  ;;  %v803_v0 = vpack.c.bf16 %v367_v56, %v366_v55  ;;  %v835_v1 = vpack.c.bf16 %v399_v59, %v398_v57  ;;  %v586_v59 = vld [vmem:[%s1047_s4] ss:$0 sm:$0xff] }
  0x77   :  { %v805_v2 = vpack.c.bf16 %v385_v61, %v384_v60 }
  0x78   :  { %720 = vmatpush1.bf16.msra.mxu0 %v719_v3  ;;  %v368_v3 = vld [vmem:[#allocation7 + $0x50] sm:$0xff] }
  0x79   :  { %784 = vmatpush1.bf16.msra.mxu1 %v783_v4  ;;  %786 = vmatprep.subr.bf16.mxu0 %v785_v5  ;;  %v369_v4 = vld [vmem:[#allocation7 + $0x58] sm:$0xff]  ;;  %v400_v5 = vld [vmem:[#allocation7 + $0x150] sm:$0xff] }
  0x7a   :  { %818 = vmatprep.subr.bf16.mxu1 %v817_v9  ;;  %v387_v9 = vld [vmem:[#allocation7 + $0xe8] sm:$0xff]  ;;  %v807_v12 = vpack.c.bf16 %v369_v4, %v368_v3  ;;  %v839_v13 = vpack.c.bf16 %v401_v7, %v400_v5 }
  0x7b   :  { %277 = vmatmul.mubr.f32.vlgmr.msra.gmra.mrb[0].mxu0 %v60_v15  ;;  %v809_v14 = vpack.c.bf16 %v387_v9, %v386_v8 }
  0x7c   :  { %348 = vmatmul.mubr.f32.vlgmr.msra.gmra.mrb[0].mxu1 %v60_v15  ;;  %788 = vmatpush3.bf16.msra.mxu0 %v787_v16  ;;  %v841_v15 = vpack.c.bf16 %v419_v11, %v418_v10  ;;  %v370_v16 = vld [vmem:[#allocation7 + $0x60] sm:$0xff] }
  0x7d   :  { %820 = vmatpush3.bf16.msra.mxu1 %v819_v17  ;;  %790 = vmatprep.subr.bf16.mxu0 %v789_v18  ;;  %v371_v17 = vld [vmem:[#allocation7 + $0x68] sm:$0xff]  ;;  %v402_v18 = vld [vmem:[#allocation7 + $0x160] sm:$0xff] }
  0x7e   :  { %822 = vmatprep.subr.bf16.mxu1 %v821_v22  ;;  %v811_v19 = vpack.c.bf16 %v371_v17, %v370_v16  ;;  %v843_v21 = vpack.c.bf16 %v403_v20, %v402_v18  ;;  %v388_v22 = vld [vmem:[#allocation7 + $0xf0] sm:$0xff] }
  0x7f   :  { %v813_v25 = vpack.c.bf16 %v389_v23, %v388_v22 }
  0x80   :  { %792 = vmatpush3.bf16.msra.mxu0 %v791_v28  ;;  %v373_v28 = vld [vmem:[#allocation7 + $0x78] sm:$0xff] }
  0x81   :  { %824 = vmatpush3.bf16.msra.mxu1 %v823_v29  ;;  %794 = vmatprep.subr.bf16.mxu0 %v793_v30  ;;  %v845_v29 = vpack.c.bf16 %v421_v26, %v420_v24  ;;  %v815_v30 = vpack.c.bf16 %v373_v28, %v372_v27 }
  0x82   :  { %826 = vmatprep.subr.bf16.mxu1 %v825_v34  ;;  %v192_v34 = vlaneseq }
  0x84   :  { %796 = vmatpush3.bf16.msra.mxu0 %v795_v40  ;;  %v193_v35 = vshrl.u32 %v192_v34, 7 }
  0x85   :  { %828 = vmatpush3.bf16.msra.mxu1 %v827_v41  ;;  %798 = vmatprep.subr.bf16.mxu0 %v797_v42 }
  0x86   :  { %830 = vmatprep.subr.bf16.mxu1 %v829_v46  ;;  %v194_v36 = vsub.s32 0, %v193_v35  ;;  %v202_v38 = vsub.s32 2, %v193_v35  ;;  %v198_v39 = vsub.s32 1, %v193_v35  ;;  %v206_v40 = vsub.s32 3, %v193_v35 }
  0x88   :  { %800 = vmatpush3.bf16.msra.mxu0 %v799_v52  ;;  %v195_v41 = vrot.slane %v190_v37, %v194_v36  ;;  %v203_v42 = vrot.slane %v190_v37, %v202_v38  ;;  %v199_v43 = vrot.slane %v190_v37, %v198_v39  ;;  %v207_v44 = vrot.slane %v190_v37, %v206_v40 }
  0x89   :  { %832 = vmatpush3.bf16.msra.mxu1 %v831_v53  ;;  %802 = vmatprep.subr.bf16.mxu0 %v801_v54 }
  0x8a   :  { %834 = vmatprep.subr.bf16.mxu1 %v833_v58 }
  0x8c   :  { %804 = vmatpush3.bf16.msra.mxu0 %v803_v0 }
  0x8d   :  { %836 = vmatpush3.bf16.msra.mxu1 %v835_v1  ;;  %806 = vmatprep.subr.bf16.mxu0 %v805_v2 }
  0x8e   :  { %838 = vmatprep.subr.bf16.mxu1 %v837_v6 }
  0x90   :  { %808 = vmatpush3.bf16.msra.mxu0 %v807_v12 }
  0x91   :  { %840 = vmatpush3.bf16.msra.mxu1 %v839_v13  ;;  %810 = vmatprep.subr.bf16.mxu0 %v809_v14 }
  0x92   :  { %842 = vmatprep.subr.bf16.mxu1 %v841_v15 }
  0x94   :  { %812 = vmatpush3.bf16.msra.mxu0 %v811_v19 }
  0x95   :  { %844 = vmatpush3.bf16.msra.mxu1 %v843_v21  ;;  %814 = vmatprep.subr.bf16.mxu0 %v813_v25 }
  0x96   :  { %846 = vmatprep.subr.bf16.mxu1 %v845_v29 }
  0x98   :  { %816 = vmatpush3.bf16.msra.mxu0 %v815_v30 }
  0x99   :  { %848 = vmatpush3.bf16.msra.mxu1 %v847_v33 }
 0x14e   :  { %v278_v45 = vpop.f32.mrb[0].mxu0 }
 0x14f   :  { %v279_v46 = vadd.f32 %v278_v45, %v195_v41  ;;  %v349_v47 = vpop.f32.mrb[0].mxu1  ;;  %v280_v48 = vpop.f32.mrb[1].mxu0 }
 0x150   :  { %v350_v49 = vadd.f32 %v349_v47, %v203_v42  ;;  %v281_v50 = vadd.f32 %v280_v48, %v199_v43  ;;  %v351_v51 = vpop.f32.mrb[1].mxu1 }
 0x151   :  { %v352_v52 = vadd.f32 %v351_v51, %v207_v44  ;;  %v354_v55 = vmax.f32 %v279_v46, 0.0 }
 0x152   :  { %v356_v53 = vmax.f32 %v350_v49, 0.0  ;;  %v355_v54 = vmax.f32 %v281_v50, 0.0 }
 0x153   :  { %v357_v56 = vmax.f32 %v352_v52, 0.0 }
 0x154   :  { %493 = vmatprep.mubr.f32.mxu0 %v355_v54 }
 0x155   :  { %563 = vmatprep.mubr.f32.mxu1 %v357_v56  ;;  %494 = vmatmul.mubr.f32.vlgmr.msra.gmra.mrb[2].mxu0 %v354_v55 }
 0x156   :  { %564 = vmatmul.mubr.f32.vlgmr.msra.gmra.mrb[2].mxu1 %v356_v53 }
 0x228   :  { %v619_v57 = vpop.f32.mrb[2].mxu0 }
 0x229   :  { %v654_v58 = vpop.f32.mrb[2].mxu1  ;;  %v620_v60 = vpop.f32.mrb[3].mxu0 }
 0x22a   :  { %v621_v61 = vadd.f32 %v620_v60, %v619_v57  ;;  %v655_v62 = vpop.f32.mrb[3].mxu1 }
 0x22b   :  { %v656_v63 = vadd.f32 %v655_v62, %v654_v58 }
 0x22c   :  { %v496_v0 = vadd.f32 %v621_v61, %v586_v59 }
 0x22e   :  { %v566_v1 = vadd.f32 %v656_v63, %v496_v0 }
 0x230   :  { %569 = vst [vmem:[#allocation8] sm:$0xff] %v566_v1 }
 0x231   :  { %934 = shalt.err (!%p931_p0)
}
 0x232   :  { %s935_s4 = scalar_lea.hbm %s1048_s5, 128 }
 0x233   :  { %p936_p1 = scmp.ne.s32.totalorder %s1048_s5, %s935_s4  ;;  %p939_p2 = scmp.lt.u32.totalorder %s935_s4, %s1048_s5 }
 0x235   :  { %p941_p3 = pnand %p939_p2, %p936_p1 }
 0x237   :  { %944 = shalt.err (!%p941_p3)
}
 0x238   :  { %579 = dma.vmem_to_hbm [thread:$0]  %s577_s9, 128, %s1048_s5, [#allocation4]  }
 0x239   :  { %949 = dma.done.wait [#allocation4], 128  }
 0x23a   :  { %950 = vsyncadd [#allocation4], 4294967168 }
 0x23b   :  { %583 = vsyncpa [#allocation3], 1 }
 0x23c   :  { %584 = vsyncpa [#allocation6], 1 }
 0x23d   :  { %585 = vsyncpa [#allocation4], 1 }

</bundles_post_ra>
